<compile_context>
chip_gen: v5e
topology: v5e:2x2
jax: 0.10.0
libtpu: 0.0.40
codegen_flags: <defaults>
</compile_context>

<pallas_src>
import functools

import jax
import jax.numpy as jnp
from jax.experimental import pallas as pl
from jax.experimental.pallas import tpu as pltpu

_LANES = 128
_SUBLANES = 8
_MAX_TILE_ROWS = 4096            # 4096 x 128 x 4B = 2 MiB per f32 input tile
_PAD_UNIT = _SUBLANES * _LANES   # 1024: keeps rows a multiple of 8
_FAST_PATH_ELEMS = 64 * 1024     # below this, XLA fusion beats pallas dispatch
_NUM_SLICES = 2                  # leading "parallel" axis (2 TCs on v7x)


def _round_up(x: int, m: int) -> int:
    return ((x + m - 1) // m) * m


def _mse_partial_kernel(h_ref, t_ref, o_ref, acc_ref, *, total_rows: int):
    """Per grid slice: accumulate sum((h-t)^2) into an (8,128) VMEM accumulator.

    Grid = (num_slices, steps); slice `c` owns logical tiles
    [c*steps, (c+1)*steps).  The accumulator is initialized at i==0 and dumped
    to this slice's (8,128) output block at i==steps-1; the scalar reduce and
    the divide by N happen in the wrapper.
    """
    c = pl.program_id(0)
    i = pl.program_id(1)
    steps = pl.num_programs(1)
    tile_rows, lanes = h_ref.shape

    @pl.when(i == 0)
    def _init():
        acc_ref[...] = jnp.zeros_like(acc_ref)

    # Upcast per-tile on the VPU; HBM traffic stays in the native input dtype.
    d = h_ref[...].astype(jnp.float32) - t_ref[...].astype(jnp.float32)

    # Static (trace-time) decision: only emit the mask when the last tile
    # extends past the true row count (rows beyond it hold garbage).
    if total_rows % tile_rows != 0:
        tile_idx = c * steps + i
        valid_rows = total_rows - tile_idx * tile_rows
        row_ids = jax.lax.broadcasted_iota(jnp.int32, (tile_rows, lanes), 0)
        d = jnp.where(row_ids < valid_rows, d, 0.0)

    # Pure-VPU accumulation: fold (tile_rows,128) -> (tile_rows//8, 8, 128)
    # (layout-preserving split of the sublane dim) and add along the leading
    # dim.  No XLU / scalar work on the per-step critical path.
    acc_ref[...] += jnp.sum((d * d).reshape(tile_rows // _SUBLANES, _SUBLANES, lanes),
                            axis=0)

    @pl.when(i == steps - 1)
    def _finalize():
        o_ref[...] = acc_ref[...]


def mse_loss(hypothesis: jax.Array, target: jax.Array, *,
             force_kernel: bool = False) -> jax.Array:
    """Pallas TPU implementation of nn.MSELoss() (mean reduction)."""
    assert hypothesis.shape == target.shape, (hypothesis.shape, target.shape)
    n_total = hypothesis.size

    # Small-N fast path: pallas dispatch overhead dominates tiny losses.
    if n_total <= _FAST_PATH_ELEMS and not force_kernel:
        d = hypothesis.astype(jnp.float32) - target.astype(jnp.float32)
        return jnp.mean(d * d)

    # Lane-dense (rows, 128) presentation; contiguous reshapes are free.
    h = hypothesis.reshape(-1)
    t = target.reshape(-1)
    padded = _round_up(n_total, _PAD_UNIT)
    if padded != n_total:
        # Only hit when n_total is not a multiple of 1024 (<=1023 zeros; both
        # operands padded identically -> zero contribution to the sum).
        # TODO(synk): copy-free tail handling (1-D blocks + lane masking).
        h = jnp.pad(h, (0, padded - n_total))
        t = jnp.pad(t, (0, padded - n_total))
    rows = padded // _LANES
    h2 = h.reshape(rows, _LANES)
    t2 = t.reshape(rows, _LANES)

    # ---- Tiling + 2-slice split (no wasted steps by construction) ----------
    t0 = pl.cdiv(rows, _MAX_TILE_ROWS)
    if t0 <= 1:
        num_slices, tile_rows, steps = 1, rows, 1          # single full block
    else:
        t_even = _NUM_SLICES * pl.cdiv(t0, _NUM_SLICES)    # even tile target
        tile_rows = _round_up(pl.cdiv(rows, t_even), 32)   # 32: bf16/int8 safe
        num_tiles = pl.cdiv(rows, tile_rows)
        if num_tiles % _NUM_SLICES == 0:
            num_slices, steps = _NUM_SLICES, num_tiles // _NUM_SLICES
        else:
            num_slices, steps = 1, num_tiles               # rare fallback

    kernel = functools.partial(_mse_partial_kernel, total_rows=rows)
    in_spec = pl.BlockSpec((tile_rows, _LANES),
                           lambda c, i, steps=steps: (c * steps + i, 0))

    partials = pl.pallas_call(
        kernel,
        out_shape=jax.ShapeDtypeStruct((_SUBLANES * num_slices, _LANES),
                                       jnp.float32),
        grid=(num_slices, steps),
        in_specs=[in_spec, in_spec],
        out_specs=pl.BlockSpec((_SUBLANES, _LANES), lambda c, i: (c, 0)),
        scratch_shapes=[pltpu.VMEM((_SUBLANES, _LANES), jnp.float32)],
        compiler_params=pltpu.CompilerParams(
            dimension_semantics=("parallel", "arbitrary"),
            vmem_limit_bytes=32 * 1024 * 1024,
        ),
    )(h2, t2)

    # Tiny final reduce (<= 2 x (8,128) elements) + divide by the TRUE count.
    return jnp.sum(partials) / jnp.float32(n_total)


if __name__ == "__main__":
    # Spec shapes: target = arange(0,10).float().unsqueeze(-1)*5 + 10 -> (10,1)
    target = (jnp.arange(0, 10, dtype=jnp.float32)[:, None] * 5.0) + 10.0
    key = jax.random.PRNGKey(0)
    hypothesis = jax.random.normal(key, (10, 1), dtype=jnp.float32) * 10.0 + 30.0

    # Module-sized input, forced through the Pallas kernel path.
    loss = mse_loss(hypothesis, target, force_kernel=True)
    jax.block_until_ready(loss)
    ref = jnp.mean((hypothesis - target) ** 2)
    assert jnp.allclose(loss, ref, rtol=1e-5, atol=1e-4), (loss, ref)

    k1, k2, k3, k4 = jax.random.split(key, 4)

    # Exercises the pad branch + single full-block grid.
    h_a = jax.random.normal(k1, (257, 513), dtype=jnp.float32)
    t_a = jax.random.normal(k2, (257, 513), dtype=jnp.float32)
    loss_a = mse_loss(h_a, t_a)
    jax.block_until_ready(loss_a)
    ref_a = jnp.mean((h_a - t_a) ** 2)
    assert jnp.allclose(loss_a, ref_a, rtol=1e-4, atol=1e-5), (loss_a, ref_a)

    # Exercises the copy-free path: 2-slice "parallel" split, multi-step
    # accumulation per slice, partial last block masked in-kernel.
    h_b = jax.random.normal(k3, (1501, 1024), dtype=jnp.float32)
    t_b = jax.random.normal(k4, (1501, 1024), dtype=jnp.float32)
    loss_b = mse_loss(h_b, t_b)
    jax.block_until_ready(loss_b)
    ref_b = jnp.mean((h_b - t_b) ** 2)
    assert jnp.allclose(loss_b, ref_b, rtol=1e-4, atol=1e-5), (loss_b, ref_b)

    print("KERNEL_OK")
</pallas_src>

<mosaic_0001>
module attributes {stable_mosaic.version = 11 : i64} {
  func.func @_mse_partial_kernel(%arg0: i32, %arg1: i32, %arg2: memref<8x128xf32, #tpu.memory_space<vmem>>, %arg3: memref<8x128xf32, #tpu.memory_space<vmem>>, %arg4: memref<8x128xf32, #tpu.memory_space<vmem>>, %arg5: memref<8x128xf32, #tpu.memory_space<vmem>>) attributes {dimension_semantics = [#tpu.dimension_semantics<parallel>, #tpu.dimension_semantics<arbitrary>], iteration_bounds = array<i64: 1, 1>, scalar_prefetch = 0 : i64, scratch_operands = 1 : i64, tpu.core_type = #tpu.core_type<tc>, window_params = [{transform_indices = @transform_0, window_bounds = array<i64: 8, 128>}, {transform_indices = @transform_1, window_bounds = array<i64: 8, 128>}, {transform_indices = @transform_2, window_bounds = array<i64: 8, 128>}]} {
    %c0_i32 = arith.constant 0 : i32
    %0 = arith.cmpi eq, %arg1, %c0_i32 : i32
    %1 = arith.extui %0 : i1 to i32
    %c0_i32_0 = arith.constant 0 : i32
    %2 = arith.cmpi ne, %1, %c0_i32_0 : i32
    scf.if %2 {
      %cst_10 = arith.constant 0.000000e+00 : f32
      %15 = vector.broadcast %cst_10 : f32 to vector<8x128xf32>
      %c0_11 = arith.constant 0 : index
      %c0_12 = arith.constant 0 : index
      %16 = vector.load %arg5[%c0_11, %c0_12] : memref<8x128xf32, #tpu.memory_space<vmem>>, vector<8x128xf32>
      tpu.vector_store %arg5[%c0_11, %c0_12], %15 {strides = array<i32>} : memref<8x128xf32, #tpu.memory_space<vmem>>, vector<8x128xf32>,
    } else {
    }
    %c0 = arith.constant 0 : index
    %c0_1 = arith.constant 0 : index
    %3 = vector.load %arg2[%c0, %c0_1] : memref<8x128xf32, #tpu.memory_space<vmem>>, vector<8x128xf32>
    %c0_2 = arith.constant 0 : index
    %c0_3 = arith.constant 0 : index
    %4 = vector.load %arg3[%c0_2, %c0_3] : memref<8x128xf32, #tpu.memory_space<vmem>>, vector<8x128xf32>
    %5 = arith.subf %3, %4 : vector<8x128xf32>
    %c0_4 = arith.constant 0 : index
    %c0_5 = arith.constant 0 : index
    %6 = vector.load %arg5[%c0_4, %c0_5] : memref<8x128xf32, #tpu.memory_space<vmem>>, vector<8x128xf32>
    %7 = arith.mulf %5, %5 : vector<8x128xf32>
    %8 = vector.shape_cast %7 : vector<8x128xf32> to vector<1x8x128xf32>
    %cst = arith.constant dense<0.000000e+00> : vector<8x128xf32>
    %9 = vector.multi_reduction <add>, %8, %cst [0] : vector<1x8x128xf32> to vector<8x128xf32>
    %10 = arith.addf %6, %9 : vector<8x128xf32>
    %c0_6 = arith.constant 0 : index
    %c0_7 = arith.constant 0 : index
    %11 = vector.load %arg5[%c0_6, %c0_7] : memref<8x128xf32, #tpu.memory_space<vmem>>, vector<8x128xf32>
    tpu.vector_store %arg5[%c0_6, %c0_7], %10 {strides = array<i32>} : memref<8x128xf32, #tpu.memory_space<vmem>>, vector<8x128xf32>,
    %c0_i32_8 = arith.constant 0 : i32
    %12 = arith.cmpi eq, %arg1, %c0_i32_8 : i32
    %13 = arith.extui %12 : i1 to i32
    %c0_i32_9 = arith.constant 0 : i32
    %14 = arith.cmpi ne, %13, %c0_i32_9 : i32
    scf.if %14 {
      %c0_10 = arith.constant 0 : index
      %c0_11 = arith.constant 0 : index
      %15 = vector.load %arg5[%c0_10, %c0_11] : memref<8x128xf32, #tpu.memory_space<vmem>>, vector<8x128xf32>
      %c0_12 = arith.constant 0 : index
      %c0_13 = arith.constant 0 : index
      %16 = vector.load %arg4[%c0_12, %c0_13] : memref<8x128xf32, #tpu.memory_space<vmem>>, vector<8x128xf32>
      tpu.vector_store %arg4[%c0_12, %c0_13], %15 {strides = array<i32>} : memref<8x128xf32, #tpu.memory_space<vmem>>, vector<8x128xf32>,
    } else {
    }
    return
  }
  func.func @transform_0(%arg0: i32, %arg1: i32) -> (i32, i32) {
    %c1_i32 = arith.constant 1 : i32
    %0 = arith.muli %arg0, %c1_i32 : i32
    %1 = arith.addi %0, %arg1 : i32
    %c0_i32 = arith.constant 0 : i32
    %c0_i32_0 = arith.constant 0 : i32
    return %1, %c0_i32 : i32, i32
  }
  func.func @transform_1(%arg0: i32, %arg1: i32) -> (i32, i32) {
    %c1_i32 = arith.constant 1 : i32
    %0 = arith.muli %arg0, %c1_i32 : i32
    %1 = arith.addi %0, %arg1 : i32
    %c0_i32 = arith.constant 0 : i32
    %c0_i32_0 = arith.constant 0 : i32
    return %1, %c0_i32 : i32, i32
  }
  func.func @transform_2(%arg0: i32, %arg1: i32) -> (i32, i32) {
    %c0_i32 = arith.constant 0 : i32
    %c0_i32_0 = arith.constant 0 : i32
    return %arg0, %c0_i32 : i32, i32
  }
}

</mosaic_0001>

<bundles_post_ra>
// kernel: tpu_custom_call.1
= control target key start
LH: loop header
LB: loop body
LE: loop exit
PB: predicated region body
PF: predicated region fallthrough
CT: control target
= control target key end

     0   :  { %7 = vsyncpa [#allocation4], 0  ;;  %s192_s0 = inlined_call_operand.hbm [shape: f32[8,128], index: 0, kind: input, shape index: {}]   ;;  %s193_s1 = inlined_call_operand.hbm [shape: f32[8,128], index: 1, kind: input, shape index: {}]   ;;  %s194_s2 = inlined_call_operand.hbm [shape: f32[8,128], index: 2, kind: output, shape index: {}]  }
   0x1   :  { %8 = vsyncpa [#allocation7], 0 }
   0x2   :  { %9 = vsyncpa [#allocation5], 0  ;;  %s18_s11 = sshll.u32 %s192_s0, 4  ;;  %s165_s12 = smov [#allocation3]   ;;  %s19_s11 = int_to_ptr.hbm [resolvable:$true] %s18_s11 }
   0x3   :  { %s20_s13 = sshll.u32 %s165_s12, 4  ;;  %s32_s16 = sshll.u32 %s193_s1, 4  ;;  %s21_s13 = int_to_ptr.vmem [resolvable:$true] %s20_s13  ;;  %s33_s16 = int_to_ptr.hbm [resolvable:$true] %s32_s16 }
   0x4   :  { %23 = dma.hbm_to_vmem [thread:$0]  %s19_s11, 128, %s21_s13, [#allocation4]  }
   0x5   :  { %s166_s17 = smov [#allocation6]  }
   0x6   :  { %s34_s18 = sshll.u32 %s166_s17, 4  ;;  %s35_s18 = int_to_ptr.vmem [resolvable:$true] %s34_s18 }
   0x7   :  { %37 = dma.hbm_to_vmem [thread:$0]  %s33_s16, 128, %s35_s18, [#allocation7]  }
   0x8   :  { %159 = dma.done.wait [#allocation4], 128  }
   0x9   :  { %160 = vsyncadd [#allocation4], 4294967168 }
   0xa   :  { %161 = dma.done.wait [#allocation7], 128  }
   0xb   :  { %162 = vsyncadd [#allocation7], 4294967168  ;;  %v53_v0 = vld [vmem:[#allocation3] sm:$0xff]  ;;  %v54_v1 = vld [vmem:[#allocation6] sm:$0xff]  ;;  %s167_s0 = smov [#allocation8]   ;;  %s73_s22 = sshll.u32 %s194_s2, 4  ;;  %s74_s22 = int_to_ptr.hbm [resolvable:$true] %s73_s22 }
   0xc   :  { %s71_s19 = sshll.u32 %s167_s0, 4  ;;  %v55_v2 = vsub.f32 %v53_v0, %v54_v1  ;;  %s72_s19 = int_to_ptr.vmem [resolvable:$true] %s71_s19 }
   0xe   :  { %v57_v3 = vmul.f32 %v55_v2, %v55_v2 }
  0x10   :  { %65 = vst [vmem:[#allocation8] sm:$0xff] %v57_v3 }
  0x11   :  { %76 = dma.vmem_to_hbm [thread:$0]  %s72_s19, 128, %s74_s22, [#allocation5]  }
  0x12   :  { %163 = dma.done.wait [#allocation5], 128  }
  0x13   :  { %164 = vsyncadd [#allocation5], 4294967168 }
  0x14   :  { %81 = vsyncpa [#allocation4], 1 }
  0x15   :  { %82 = vsyncpa [#allocation7], 1 }
  0x16   :  { %83 = vsyncpa [#allocation5], 1 }

</bundles_post_ra>
